<compile_context>
chip_gen: v5e
topology: v5e:2x2
jax: 0.10.0
libtpu: 0.0.40
codegen_flags: <defaults>
</compile_context>

<pallas_src>
import math
import functools

import jax
import jax.numpy as jnp
from jax import lax
from jax.experimental import pallas as pl
from jax.experimental.pallas import tpu as pltpu


# Set to jnp.bfloat16 on v6e / v7x for MXU throughput (review); f32 keeps the test tight.
MATMUL_INPUT_DTYPE = jnp.float32
_EPS = 1e-4


def _vmem_limit_bytes():
    """Derive the scoped-VMEM limit from the hardware (review: no hard-coded 32 MiB)."""
    try:
        cap = int(pltpu.get_tpu_info().vmem_capacity_bytes)
        return int(min(cap // 2, 64 * 1024 * 1024))
    except Exception:
        return 32 * 1024 * 1024


def _round_up(x, m):
    return ((x + m - 1) // m) * m


def _pick_tile(dim, cap, align):
    """Largest tile <= cap that divides dim and respects alignment; None if no divisor."""
    if dim <= cap:
        return dim
    t = (cap // align) * align
    while t >= align:
        if dim % t == 0:
            return t
        t -= align
    return None


# ---------------------------------------------------------------------------
# Parameter construction (deterministic, in-script)
# ---------------------------------------------------------------------------
def gaussian_orthogonal_random_matrix(key, nb_rows, nb_columns, scaling=0):
    """Reproduces Performer's gaussian_orthogonal_random_matrix (qr_uniform_q=False)."""
    nb_full_blocks = nb_rows // nb_columns
    keys = jax.random.split(key, nb_full_blocks + 2)
    blocks = []
    for i in range(nb_full_blocks):
        g = jax.random.normal(keys[i], (nb_columns, nb_columns), jnp.float32)
        q, _ = jnp.linalg.qr(g)
        blocks.append(q.T)
    remaining = nb_rows - nb_full_blocks * nb_columns
    if remaining > 0:
        g = jax.random.normal(keys[nb_full_blocks], (nb_columns, nb_columns), jnp.float32)
        q, _ = jnp.linalg.qr(g)
        blocks.append(q.T[:remaining])
    final = jnp.concatenate(blocks, axis=0)
    if scaling == 0:
        multiplier = jnp.linalg.norm(
            jax.random.normal(keys[-1], (nb_rows, nb_columns), jnp.float32), axis=1)
    elif scaling == 1:
        multiplier = jnp.full((nb_rows,), math.sqrt(float(nb_columns)), jnp.float32)
    else:
        raise ValueError("invalid scaling")
    return multiplier[:, None] * final


def init_params(key, dim, heads, dim_head, nb_features):
    inner = heads * dim_head
    ks = jax.random.split(key, 9)

    def lin(kw, kb, fan_in, fan_out):
        bound = 1.0 / math.sqrt(fan_in)
        w = jax.random.uniform(kw, (fan_in, fan_out), jnp.float32, -bound, bound)
        b = jax.random.uniform(kb, (fan_out,), jnp.float32, -bound, bound)
        return w, b

    wq, bq = lin(ks[0], ks[1], dim, inner)
    wk, bk = lin(ks[2], ks[3], dim, inner)
    wv, bv = lin(ks[4], ks[5], dim, inner)
    wo, bo = lin(ks[6], ks[7], inner, dim)
    proj = gaussian_orthogonal_random_matrix(ks[8], nb_features, dim_head, scaling=0)
    return dict(wq=wq, bq=bq, wk=wk, bk=bk, wv=wv, bv=bv, wo=wo, bo=bo, proj=proj)


def prepare_params(params, heads, dim_head):
    """One-time weight preparation (review items [fold] + pre-concat).

    Folds the Performer random-feature projection into the QKV weights so q_dash/k_dash
    for every head come straight out of the tiled projection matmuls, and groups columns
    so phase 1 (kv_stats) and phase 2 (attend) each read exactly the columns they need:
        kv projection -> [ k | v | k_dash ]   (2*inner + H*M cols)
        q  projection -> [ q | q_dash ]       (  inner + H*M cols)
    """
    dim = params['wq'].shape[0]
    proj = params['proj']                                  # (M, Dh)
    nb_features = proj.shape[0]
    normalizer = float(dim_head) ** -0.25

    def fold(w, b):
        w_h = w.reshape(dim, heads, dim_head)
        wf = normalizer * jnp.einsum('dhe,me->dhm', w_h, proj)
        bf = normalizer * jnp.einsum('he,me->hm', b.reshape(heads, dim_head), proj)
        return wf.reshape(dim, heads * nb_features), bf.reshape(heads * nb_features)

    wqf, bqf = fold(params['wq'], params['bq'])
    wkf, bkf = fold(params['wk'], params['bk'])
    w_kv = jnp.concatenate([params['wk'], params['wv'], wkf], axis=1)
    b_kv = jnp.concatenate([params['bk'], params['bv'], bkf], axis=0)
    w_q = jnp.concatenate([params['wq'], wqf], axis=1)
    b_q = jnp.concatenate([params['bq'], bqf], axis=0)
    return dict(w_kv=w_kv, b_kv=b_kv, w_q=w_q, b_q=b_q,
                wo=params['wo'], bo=params['bo'])


# ---------------------------------------------------------------------------
# Tiled linear kernel:  y = x @ W + b   (512 tile caps, pad + slice for ragged dims)
# ---------------------------------------------------------------------------
def _linear_kernel(x_ref, w_ref, b_ref, o_ref, acc_ref):
    @pl.when(pl.program_id(2) == 0)
    def _():
        acc_ref[...] = jnp.zeros_like(acc_ref)

    acc_ref[...] += jnp.dot(x_ref[...].astype(MATMUL_INPUT_DTYPE),
                            w_ref[...].astype(MATMUL_INPUT_DTYPE),
                            preferred_element_type=jnp.float32)

    @pl.when(pl.program_id(2) == pl.num_programs(2) - 1)
    def _():
        o_ref[...] = (acc_ref[...] + b_ref[...]).astype(o_ref.dtype)


def pallas_linear(x2d, w, b, *, tm_cap=512, tn_cap=512, tk_cap=512):
    M0, K0 = x2d.shape
    N0 = w.shape[1]
    # Prefer an aligned divisor tile; otherwise cap + zero-pad (no untiled fallback -> no
    # VMEM blow-up for awkward dims; padded K contributes exact zeros to the accumulation).
    tm = _pick_tile(M0, tm_cap, 8) or tm_cap
    tn = _pick_tile(N0, tn_cap, 128) or tn_cap
    tk = _pick_tile(K0, tk_cap, 128) or tk_cap
    Mp, Kp, Np = _round_up(M0, tm), _round_up(K0, tk), _round_up(N0, tn)
    if (Mp, Kp) != (M0, K0):
        x2d = jnp.pad(x2d, ((0, Mp - M0), (0, Kp - K0)))
    if (Kp, Np) != (K0, N0):
        w = jnp.pad(w, ((0, Kp - K0), (0, Np - N0)))
    if Np != N0:
        b = jnp.pad(b, (0, Np - N0))

    out = pl.pallas_call(
        _linear_kernel,
        out_shape=jax.ShapeDtypeStruct((Mp, Np), jnp.float32),
        grid=(Mp // tm, Np // tn, Kp // tk),
        in_specs=[pl.BlockSpec((tm, tk), lambda i, j, k: (i, k)),
                  pl.BlockSpec((tk, tn), lambda i, j, k: (k, j)),
                  pl.BlockSpec((1, tn), lambda i, j, k: (0, j))],
        out_specs=pl.BlockSpec((tm, tn), lambda i, j, k: (i, j)),
        scratch_shapes=[pltpu.VMEM((tm, tn), jnp.float32)],
        compiler_params=pltpu.CompilerParams(
            dimension_semantics=("parallel", "parallel", "arbitrary"),
            vmem_limit_bytes=_vmem_limit_bytes()),
    )(x2d, w, b.reshape(1, Np))
    if (Mp, Np) != (M0, N0):
        out = out[:M0, :N0]
    return out


# ---------------------------------------------------------------------------
# Phase 1: stream K/V tiles, accumulate k_sum and per-head context (lane-dense).
# ---------------------------------------------------------------------------
def _kv_stats_kernel(kmax_ref, kv_ref, ksum_ref, ctx_ref, *,
                     heads, dim_head, nb_features, n_valid, n_tile, masked):
    inner = heads * dim_head
    normalizer = float(dim_head) ** -0.25
    diag_scale = 0.5 * normalizer * normalizer
    ratio = float(nb_features) ** -0.5

    @pl.when(pl.program_id(1) == 0)
    def _():
        ksum_ref[...] = jnp.zeros_like(ksum_ref)
        ctx_ref[...] = jnp.zeros_like(ctx_ref)

    kv = kv_ref[0]                                        # (tile, 2*inner + H*M)
    k = kv[:, :inner]
    v = kv[:, inner:2 * inner]
    kd = kv[:, 2 * inner:]                                # lane-dense k_dash (from the fold)

    # Per-head diag terms are tiny (tile,1) reductions; the stabilizer is assembled once
    # and a SINGLE exp pass runs over the whole lane-dense (tile, H*M) slab.
    stab_parts = []
    for h in range(heads):
        k_h = k[:, h * dim_head:(h + 1) * dim_head]
        k_diag_h = diag_scale * jnp.sum(k_h * k_h, axis=-1, keepdims=True)   # (tile, 1)
        stab_parts.append(jnp.broadcast_to(k_diag_h, (k_h.shape[0], nb_features)))
    stab = jnp.concatenate(stab_parts, axis=1) + kmax_ref[0]                  # (tile, H*M)
    k_prime = ratio * (jnp.exp(kd - stab) + _EPS)

    if masked:   # zero out padded sequence rows so they don't pollute the statistics
        rows = (lax.broadcasted_iota(jnp.int32, k_prime.shape, 0)
                + pl.program_id(1) * n_tile)
        k_prime = jnp.where(rows < n_valid, k_prime, 0.0)

    ksum_ref[0] += jnp.sum(k_prime, axis=0, keepdims=True)                    # (1, H*M)

    # Per-head k'^T v is inherently per-head; assemble and accumulate lane-dense (M, inner)
    # in ONE update (no per-head masked stores).
    ctx_parts = []
    for h in range(heads):
        kp_h = k_prime[:, h * nb_features:(h + 1) * nb_features]
        v_h = v[:, h * dim_head:(h + 1) * dim_head]
        ctx_parts.append(lax.dot_general(
            kp_h.astype(MATMUL_INPUT_DTYPE), v_h.astype(MATMUL_INPUT_DTYPE),
            (((0,), (0,)), ((), ())), preferred_element_type=jnp.float32))    # (M, Dh)
    ctx_ref[0] += jnp.concatenate(ctx_parts, axis=1)                           # (M, inner)


def pallas_kv_stats(kv3, k_max, heads, dim_head, nb_features, *, n_tile_cap=512):
    B, N, kvC = kv3.shape
    inner = heads * dim_head
    hm = heads * nb_features
    tile = _pick_tile(N, n_tile_cap, 8) or n_tile_cap
    n_pad = _round_up(N, tile)
    if n_pad != N:
        kv3 = jnp.pad(kv3, ((0, 0), (0, n_pad - N), (0, 0)))

    kernel = functools.partial(_kv_stats_kernel, heads=heads, dim_head=dim_head,
                               nb_features=nb_features, n_valid=N, n_tile=tile,
                               masked=(n_pad != N))
    ksum, ctx = pl.pallas_call(
        kernel,
        out_shape=(jax.ShapeDtypeStruct((B, 1, hm), jnp.float32),
                   jax.ShapeDtypeStruct((B, nb_features, inner), jnp.float32)),
        grid=(B, n_pad // tile),
        in_specs=[pl.BlockSpec(memory_space=pltpu.MemorySpace.SMEM),
                  pl.BlockSpec((1, tile, kvC), lambda b, n: (b, n, 0))],
        out_specs=[pl.BlockSpec((1, 1, hm), lambda b, n: (b, 0, 0)),
                   pl.BlockSpec((1, nb_features, inner), lambda b, n: (b, 0, 0))],
        compiler_params=pltpu.CompilerParams(
            dimension_semantics=("parallel", "arbitrary"),
            vmem_limit_bytes=_vmem_limit_bytes()),
    )(k_max, kv3)
    return ksum, ctx


# ---------------------------------------------------------------------------
# Phase 2: per Q tile -- feature map, normalization, context matmul; one lane-dense store.
# ---------------------------------------------------------------------------
def _attend_kernel(q_ref, ksum_ref, ctx_ref, o_ref, *, heads, dim_head, nb_features):
    inner = heads * dim_head
    normalizer = float(dim_head) ** -0.25
    diag_scale = 0.5 * normalizer * normalizer
    ratio = float(nb_features) ** -0.5

    qf = q_ref[0]                                         # (tile, inner + H*M)
    q = qf[:, :inner]
    qd = qf[:, inner:]                                    # lane-dense q_dash (from the fold)

    stab_parts = []
    for h in range(heads):
        q_h = q[:, h * dim_head:(h + 1) * dim_head]
        qd_h = qd[:, h * nb_features:(h + 1) * nb_features]
        q_diag_h = diag_scale * jnp.sum(q_h * q_h, axis=-1, keepdims=True)    # (tile, 1)
        q_max_h = jnp.max(qd_h, axis=-1, keepdims=True)                        # (tile, 1)
        stab_parts.append(jnp.broadcast_to(q_diag_h + q_max_h,
                                           (q_h.shape[0], nb_features)))
    stab = jnp.concatenate(stab_parts, axis=1)                                 # (tile, H*M)
    q_prime = ratio * (jnp.exp(qd - stab) + _EPS)          # single EUP pass over the slab

    ksum = ksum_ref[0]                                     # (1, H*M)
    ctx = ctx_ref[0]                                       # (M, inner)

    outs = []
    for h in range(heads):
        qp_h = q_prime[:, h * nb_features:(h + 1) * nb_features]               # (tile, M)
        ks_h = ksum[:, h * nb_features:(h + 1) * nb_features]                   # (1, M)
        ctx_h = ctx[:, h * dim_head:(h + 1) * dim_head]                          # (M, Dh)
        denom = jnp.sum(qp_h * ks_h, axis=-1, keepdims=True)                     # (tile, 1)
        num = jnp.dot(qp_h.astype(MATMUL_INPUT_DTYPE),
                      ctx_h.astype(MATMUL_INPUT_DTYPE),
                      preferred_element_type=jnp.float32)                        # (tile, Dh)
        outs.append(num * pl.reciprocal(denom, approx=True))     # EUP vrcp (review)
    o_ref[0] = jnp.concatenate(outs, axis=1)               # ONE lane-dense (tile, inner) store


def pallas_attend(q3, ksum, ctx, heads, dim_head, nb_features, *, n_tile_cap=512):
    B, N, qC = q3.shape
    inner = heads * dim_head
    hm = heads * nb_features
    tile = _pick_tile(N, n_tile_cap, 8) or n_tile_cap
    n_pad = _round_up(N, tile)
    if n_pad != N:
        q3 = jnp.pad(q3, ((0, 0), (0, n_pad - N), (0, 0)))

    kernel = functools.partial(_attend_kernel, heads=heads, dim_head=dim_head,
                               nb_features=nb_features)
    out = pl.pallas_call(
        kernel,
        out_shape=jax.ShapeDtypeStruct((B, n_pad, inner), jnp.float32),
        grid=(B, n_pad // tile),
        in_specs=[pl.BlockSpec((1, tile, qC), lambda b, n: (b, n, 0)),
                  pl.BlockSpec((1, 1, hm), lambda b, n: (b, 0, 0)),
                  pl.BlockSpec((1, nb_features, inner), lambda b, n: (b, 0, 0))],
        out_specs=pl.BlockSpec((1, tile, inner), lambda b, n: (b, n, 0)),
        compiler_params=pltpu.CompilerParams(
            dimension_semantics=("parallel", "parallel"),   # >=2 parallel steps (v7x 2 TCs)
            vmem_limit_bytes=_vmem_limit_bytes()),
    )(q3, ksum, ctx)
    if n_pad != N:
        out = out[:, :N, :]
    return out


# ---------------------------------------------------------------------------
# SelfAttention forward (defaults: causal=False, local_heads=0, dropout=0,
# no_projection=False, generalized_attention=False, mask/context=None)
# ---------------------------------------------------------------------------
def self_attention_forward(fparams, x, heads, dim_head, nb_features):
    B, N, D = x.shape
    inner = heads * dim_head
    hm = heads * nb_features
    x2d = x.reshape(B * N, D)

    # Fused projections with the random-feature fold baked into the weights (lane-dense
    # slabs, no head-split transposes, no in-kernel feature-map matmuls).
    kv_feats = pallas_linear(x2d, fparams['w_kv'], fparams['b_kv'])    # (B*N, 2*inner+hm)
    q_feats = pallas_linear(x2d, fparams['w_q'], fparams['b_q'])       # (B*N,   inner+hm)

    # Exact Performer GLOBAL key stabilizer (torch.max over the whole k_dash): a single
    # reduction over already-materialized columns -- no recompute pass, no extra matmul.
    k_max = jnp.max(kv_feats[:, 2 * inner:]).reshape(1)

    kv3 = kv_feats.reshape(B, N, 2 * inner + hm)   # free reshape
    q3 = q_feats.reshape(B, N, inner + hm)         # free reshape

    # Phase 1: stream K/V tiles, accumulate k_sum + lane-dense per-head context.
    ksum, ctx = pallas_kv_stats(kv3, k_max, heads, dim_head, nb_features)
    # Phase 2: per Q tile, produce the attention output lane-dense as (B, N, H*Dh).
    out3 = pallas_attend(q3, ksum, ctx, heads, dim_head, nb_features)

    out2d = out3.reshape(B * N, inner)             # free reshape, no head-merge transpose
    out = pallas_linear(out2d, fparams['wo'], fparams['bo']).reshape(B, N, D)

    # TODO(synk): realperformer's linear_attention prev-state update is unpublished; the
    # prev=None path is implemented and the lane-dense (B, M, H*Dh) k'^T v context is
    # returned as fast_prev.
    fast_prev = ctx                                 # (B, nb_features, H*Dh), lane-dense
    local_prev = None                               # local_heads = 0
    return out, local_prev, fast_prev


# ---------------------------------------------------------------------------
# Pure-JAX reference (torch-faithful order of operations) for a sanity check
# ---------------------------------------------------------------------------
def reference_forward(params, x, heads, dim_head, nb_features):
    B, N, D = x.shape
    lin = lambda t, w, b: t @ w + b
    q = lin(x, params['wq'], params['bq'])
    k = lin(x, params['wk'], params['bk'])
    v = lin(x, params['wv'], params['bv'])
    split = lambda t: t.reshape(B, N, heads, dim_head).transpose(0, 2, 1, 3)
    qh, kh, vh = map(split, (q, k, v))

    normalizer = float(dim_head) ** -0.25
    ratio = float(nb_features) ** -0.5
    eps = 1e-4
    proj = params['proj']

    def feats(t):
        dash = jnp.einsum('bhnd,md->bhnm', t * normalizer, proj)
        diag = jnp.sum(t * t, -1, keepdims=True) * 0.5 * normalizer ** 2
        return dash, diag

    qd, qdg = feats(qh)
    kd, kdg = feats(kh)
    qp = ratio * (jnp.exp(qd - qdg - jnp.max(qd, -1, keepdims=True)) + eps)
    kp = ratio * (jnp.exp(kd - kdg - jnp.max(kd)) + eps)

    k_cumsum = kp.sum(-2)
    d_inv = 1.0 / jnp.einsum('bhnm,bhm->bhn', qp, k_cumsum)
    context = jnp.einsum('bhnm,bhnd->bhmd', kp, vh)
    out = jnp.einsum('bhmd,bhnm,bhn->bhnd', context, qp, d_inv)
    out = out.transpose(0, 2, 1, 3).reshape(B, N, heads * dim_head)
    out = lin(out, params['wo'], params['bo'])
    return out, context


# ---------------------------------------------------------------------------
if __name__ == "__main__":
    B, N, DIM, HEADS, DIM_HEAD = 2, 16, 32, 4, 8
    NB_FEATURES = int(DIM_HEAD * math.log(DIM_HEAD))  # = 16 (Performer default)

    key = jax.random.PRNGKey(0)
    kx, kp = jax.random.split(key)
    x = jax.random.normal(kx, (B, N, DIM), jnp.float32)
    params = init_params(kp, DIM, HEADS, DIM_HEAD, NB_FEATURES)
    fparams = prepare_params(params, HEADS, DIM_HEAD)   # one-time weight fold + concat

    out, local_prev, fast_prev = self_attention_forward(
        fparams, x, HEADS, DIM_HEAD, NB_FEATURES)
    out = jax.block_until_ready(out)
    fast_prev = jax.block_until_ready(fast_prev)

    ref_out, ref_ctx = reference_forward(params, x, HEADS, DIM_HEAD, NB_FEATURES)
    ref_ctx_dense = ref_ctx.transpose(0, 2, 1, 3).reshape(B, NB_FEATURES, HEADS * DIM_HEAD)

    assert out.shape == (B, N, DIM)
    assert fast_prev.shape == (B, NB_FEATURES, HEADS * DIM_HEAD)
    # Intended tolerance: 2e-3 (f32 everywhere; weight-fold reordering + approx EUP
    # reciprocal keep errors well inside this; bf16 MXU operands need ~1e-2).
    assert jnp.allclose(out, ref_out, atol=2e-3, rtol=2e-3)
    assert jnp.allclose(fast_prev, ref_ctx_dense, atol=2e-3, rtol=2e-3)
    print("KERNEL_OK")
</pallas_src>

<mosaic_0001>
module attributes {stable_mosaic.version = 11 : i64} {
  func.func @_linear_kernel(%arg0: i32, %arg1: i32, %arg2: i32, %arg3: memref<32x32xf32, #tpu.memory_space<vmem>>, %arg4: memref<32x128xf32, #tpu.memory_space<vmem>>, %arg5: memref<1x128xf32, #tpu.memory_space<vmem>>, %arg6: memref<32x128xf32, #tpu.memory_space<vmem>>, %arg7: memref<32x128xf32, #tpu.memory_space<vmem>>) attributes {dimension_semantics = [#tpu.dimension_semantics<parallel>, #tpu.dimension_semantics<parallel>, #tpu.dimension_semantics<arbitrary>], iteration_bounds = array<i64: 1, 1, 1>, scalar_prefetch = 0 : i64, scratch_operands = 1 : i64, tpu.core_type = #tpu.core_type<tc>, window_params = [{transform_indices = @transform_0, window_bounds = array<i64: 32, 32>}, {transform_indices = @transform_1, window_bounds = array<i64: 32, 128>}, {transform_indices = @transform_2, window_bounds = array<i64: 1, 128>}, {transform_indices = @transform_3, window_bounds = array<i64: 32, 128>}]} {
    %c0_i32 = arith.constant 0 : i32
    %0 = arith.cmpi eq, %arg2, %c0_i32 : i32
    %1 = arith.extui %0 : i1 to i32
    %c0_i32_0 = arith.constant 0 : i32
    %2 = arith.cmpi ne, %1, %c0_i32_0 : i32
    scf.if %2 {
      %cst_10 = arith.constant 0.000000e+00 : f32
      %12 = vector.broadcast %cst_10 : f32 to vector<32x128xf32>
      %c0_11 = arith.constant 0 : index
      %c0_12 = arith.constant 0 : index
      %13 = vector.load %arg7[%c0_11, %c0_12] : memref<32x128xf32, #tpu.memory_space<vmem>>, vector<32x128xf32>
      tpu.vector_store %arg7[%c0_11, %c0_12], %12 {strides = array<i32>} : memref<32x128xf32, #tpu.memory_space<vmem>>, vector<32x128xf32>,
    } else {
    }
    %c0 = arith.constant 0 : index
    %c0_1 = arith.constant 0 : index
    %3 = vector.load %arg7[%c0, %c0_1] : memref<32x128xf32, #tpu.memory_space<vmem>>, vector<32x128xf32>
    %c0_2 = arith.constant 0 : index
    %c0_3 = arith.constant 0 : index
    %4 = vector.load %arg3[%c0_2, %c0_3] : memref<32x32xf32, #tpu.memory_space<vmem>>, vector<32x32xf32>
    %c0_4 = arith.constant 0 : index
    %c0_5 = arith.constant 0 : index
    %5 = vector.load %arg4[%c0_4, %c0_5] : memref<32x128xf32, #tpu.memory_space<vmem>>, vector<32x128xf32>
    %cst = arith.constant dense<0.000000e+00> : vector<32x128xf32>
    %6 = tpu.matmul %4, %5, %cst {dimension_numbers = #tpu.dot_dimension_numbers<[1], [0], [0], [1], [0, 0, 1, 1], [], []>} : vector<32x32xf32>, vector<32x128xf32>, vector<32x128xf32> -> vector<32x128xf32>
    %7 = arith.addf %3, %6 : vector<32x128xf32>
    %c0_6 = arith.constant 0 : index
    %c0_7 = arith.constant 0 : index
    %8 = vector.load %arg7[%c0_6, %c0_7] : memref<32x128xf32, #tpu.memory_space<vmem>>, vector<32x128xf32>
    tpu.vector_store %arg7[%c0_6, %c0_7], %7 {strides = array<i32>} : memref<32x128xf32, #tpu.memory_space<vmem>>, vector<32x128xf32>,
    %c0_i32_8 = arith.constant 0 : i32
    %9 = arith.cmpi eq, %arg2, %c0_i32_8 : i32
    %10 = arith.extui %9 : i1 to i32
    %c0_i32_9 = arith.constant 0 : i32
    %11 = arith.cmpi ne, %10, %c0_i32_9 : i32
    scf.if %11 {
      %c0_10 = arith.constant 0 : index
      %c0_11 = arith.constant 0 : index
      %12 = vector.load %arg7[%c0_10, %c0_11] : memref<32x128xf32, #tpu.memory_space<vmem>>, vector<32x128xf32>
      %c0_12 = arith.constant 0 : index
      %c0_13 = arith.constant 0 : index
      %13 = vector.load %arg5[%c0_12, %c0_13] : memref<1x128xf32, #tpu.memory_space<vmem>>, vector<1x128xf32>
      %14 = vector.broadcast %13 : vector<1x128xf32> to vector<32x128xf32>
      %15 = arith.addf %12, %14 : vector<32x128xf32>
      %c0_14 = arith.constant 0 : index
      %c0_15 = arith.constant 0 : index
      %16 = vector.load %arg6[%c0_14, %c0_15] : memref<32x128xf32, #tpu.memory_space<vmem>>, vector<32x128xf32>
      tpu.vector_store %arg6[%c0_14, %c0_15], %15 {strides = array<i32>} : memref<32x128xf32, #tpu.memory_space<vmem>>, vector<32x128xf32>,
    } else {
    }
    return
  }
  func.func @transform_0(%arg0: i32, %arg1: i32, %arg2: i32) -> (i32, i32) {
    %c0_i32 = arith.constant 0 : i32
    return %arg0, %arg2 : i32, i32
  }
  func.func @transform_1(%arg0: i32, %arg1: i32, %arg2: i32) -> (i32, i32) {
    %c0_i32 = arith.constant 0 : i32
    return %arg2, %arg1 : i32, i32
  }
  func.func @transform_2(%arg0: i32, %arg1: i32, %arg2: i32) -> (i32, i32) {
    %c0_i32 = arith.constant 0 : i32
    %c0_i32_0 = arith.constant 0 : i32
    return %c0_i32, %arg1 : i32, i32
  }
  func.func @transform_3(%arg0: i32, %arg1: i32, %arg2: i32) -> (i32, i32) {
    %c0_i32 = arith.constant 0 : i32
    return %arg0, %arg1 : i32, i32
  }
}

</mosaic_0001>

<bundles_post_ra>
// kernel: tpu_custom_call.1
= control target key start
LH: loop header
LB: loop body
LE: loop exit
PB: predicated region body
PF: predicated region fallthrough
CT: control target
= control target key end

     0   :  { %8 = vsyncpa [#allocation4], 0  ;;  %s302_s0 = inlined_call_operand.hbm [shape: f32[32,32], index: 0, kind: input, shape index: {}]   ;;  %s303_s1 = inlined_call_operand.hbm [shape: f32[32,128], index: 1, kind: input, shape index: {}]   ;;  %s304_s2 = inlined_call_operand.vmem [shape: f32[1,128], index: 2, kind: input, shape index: {}]   ;;  %s305_s3 = inlined_call_operand.hbm [shape: f32[32,128], index: 3, kind: output, shape index: {}]  }
   0x1   :  { %9 = vsyncpa [#allocation7], 0 }
   0x2   :  { %10 = vsyncpa [#allocation5], 0  ;;  %s15_s14 = sshll.u32 %s302_s0, 4  ;;  %s256_s15 = smov [#allocation3]   ;;  %s16_s14 = int_to_ptr.hbm [resolvable:$true] %s15_s14 }
   0x3   :  { %s17_s16 = sshll.u32 %s256_s15, 4  ;;  %s28_s19 = sshll.u32 %s303_s1, 4  ;;  %s18_s16 = int_to_ptr.vmem [resolvable:$true] %s17_s16  ;;  %s29_s19 = int_to_ptr.hbm [resolvable:$true] %s28_s19 }
   0x4   :  { %s257_s20 = smov 128   ;;  %s258_s21 = smov 8  }
   0x5   :  { %23 = dma.hbm_to_vmem [thread:$0]  %s16_s14, 512, %s18_s16, [#allocation4], %s257_s20, %s257_s20, %s258_s21  }
   0x6   :  { %s259_s22 = smov [#allocation6]  }
   0x7   :  { %s30_s23 = sshll.u32 %s259_s22, 4  ;;  %s31_s23 = int_to_ptr.vmem [resolvable:$true] %s30_s23 }
   0x8   :  { %36 = dma.hbm_to_vmem [thread:$0]  %s29_s19, 512, %s31_s23, [#allocation7], %s257_s20, %s257_s20, %s258_s21  }
   0x9   :  { %250 = dma.done.wait [#allocation4], 512  }
   0xa   :  { %251 = vsyncadd [#allocation4], 4294966784 }
   0xb   :  { %252 = dma.done.wait [#allocation7], 512  }
   0xc   :  { %253 = vsyncadd [#allocation7], 4294966784  ;;  %v66_v0 = vld [vmem:[#allocation6 + $0x18] sm:$0xff]  ;;  %v65_v1 = vld [vmem:[#allocation6 + $0x10] sm:$0xff]  ;;  %vm67_vm0 = vcmask 261120   ;;  %s260_s24 = smov [#allocation8]  }
   0xd   :  { %161 = vmatpush.msra.mxu2 %v66_v0  ;;  %162 = vmatpush.msra.mxu3 %v66_v0  ;;  %v64_v2 = vld [vmem:[#allocation6 + $0x8] sm:$0xff]  ;;  %v63_v3 = vld [vmem:[#allocation6] sm:$0xff]  ;;  %v61_v4 = vld [vmem:[#allocation3 + $0x10] sm:$0xff]  ;;  %s140_s25 = sshll.u32 %s260_s24, 4  ;;  %s142_s28 = sshll.u32 %s305_s3, 4  ;;  %s141_s25 = int_to_ptr.vmem [resolvable:$true] %s140_s25  ;;  %s143_s28 = int_to_ptr.hbm [resolvable:$true] %s142_s28 }
   0xe   :  { %92 = vmatpush.msra.mxu0 %v66_v0  ;;  %160 = vmatpush.msra.mxu1 %v66_v0  ;;  %v62_v5 = vld [vmem:[#allocation3 + $0x18] sm:$0xff]  ;;  %v59_v6 = vld [vmem:[#allocation3] sm:$0xff]  ;;  %v60_v7 = vld [vmem:[#allocation3 + $0x8] sm:$0xff] }
   0xf   :  { %164 = vmatpush.msra.mxu2 %v65_v1  ;;  %165 = vmatpush.msra.mxu3 %v65_v1  ;;  %v177_v8 = vld [vmem:[%s304_s2] ss:$0 sm:$0xff] }
  0x10   :  { %93 = vmatpush.msra.mxu0 %v65_v1  ;;  %163 = vmatpush.msra.mxu1 %v65_v1 }
  0x11   :  { %167 = vmatpush.msra.mxu2 %v64_v2  ;;  %168 = vmatpush.msra.mxu3 %v64_v2 }
  0x12   :  { %94 = vmatpush.msra.mxu0 %v64_v2  ;;  %166 = vmatpush.msra.mxu1 %v64_v2 }
  0x13   :  { %170 = vmatpush.msra.mxu2 %v63_v3  ;;  %171 = vmatpush.msra.mxu3 %v63_v3 }
  0x14   :  { %158 = vmatmul.msk.f32.vlgmr.msra.gmra.mxu2 %vm67_vm0, %v61_v4  ;;  %159 = vmatmul.msk.f32.vlgmr.msra.gmra.mxu3 %vm67_vm0, %v62_v5 }
  0x15   :  { %95 = vmatpush.msra.mxu0 %v63_v3  ;;  %169 = vmatpush.msra.mxu1 %v63_v3 }
  0x16   :  { %156 = vmatmul.msk.f32.vlgmr.msra.gmra.mxu0 %vm67_vm0, %v59_v6  ;;  %157 = vmatmul.msk.f32.vlgmr.msra.gmra.mxu1 %vm67_vm0, %v60_v7 }
  0x93   :  { %v97_v9 = vpop.f32.mrf.mxu0  ;;  %v100_v10 = vpop.f32.mrf.mxu1 }
  0x94   :  { %v128_v11 = vadd.f32 %v177_v8, %v97_v9  ;;  %v129_v12 = vadd.f32 %v177_v8, %v100_v10 }
  0x96   :  { %132 = vst [vmem:[#allocation8] sm:$0xff] %v128_v11 }
  0x97   :  { %133 = vst [vmem:[#allocation8 + $0x8] sm:$0xff] %v129_v12  ;;  %v103_v13 = vpop.f32.mrf.mxu2  ;;  %v106_v14 = vpop.f32.mrf.mxu3 }
  0x98   :  { %v130_v15 = vadd.f32 %v177_v8, %v103_v13  ;;  %v131_v16 = vadd.f32 %v177_v8, %v106_v14 }
  0x9a   :  { %134 = vst [vmem:[#allocation8 + $0x10] sm:$0xff] %v130_v15 }
  0x9b   :  { %135 = vst [vmem:[#allocation8 + $0x18] sm:$0xff] %v131_v16 }
  0x9c   :  { %148 = dma.vmem_to_hbm [thread:$0]  %s141_s25, 512, %s143_s28, [#allocation5], %s257_s20, %s257_s20, %s258_s21  }
  0x9d   :  { %254 = dma.done.wait [#allocation5], 512  }
  0x9e   :  { %255 = vsyncadd [#allocation5], 4294966784 }
  0x9f   :  { %153 = vsyncpa [#allocation4], 1 }
  0xa0   :  { %154 = vsyncpa [#allocation7], 1 }
  0xa1   :  { %155 = vsyncpa [#allocation5], 1 }

</bundles_post_ra>
